<compile_context>
chip_gen: v7x
topology: tpu7x:2x2x1
jax: 0.10.0
libtpu: 0.0.40
codegen_flags: <defaults>
</compile_context>

<pallas_src>
import jax
import jax.numpy as jnp
from jax.experimental import pallas as pl
from jax.experimental.pallas import tpu as pltpu


def _round_up(x, m):
    return (x + m - 1) // m * m


def _make_server_kernel(num_parties):
    """Fused concat -> FC1 -> ReLU -> FC2 for one batch tile."""

    def kernel(*refs):
        x_refs = refs[:num_parties]
        w1_ref, b1_ref, w2_ref, b2_ref, o_ref = refs[num_parties:]

        # Fuse the VFL concat in VMEM (lane-axis concat is a cheap vreg
        # shuffle), then a single MXU matmul with the full K = n_parties*feat.
        if num_parties == 1:
            x = x_refs[0][...]
        else:
            x = jnp.concatenate([r[...] for r in x_refs], axis=1)

        # FC1: bf16 operands, f32 accumulation on the MXU.
        acc = jnp.dot(x, w1_ref[...], preferred_element_type=jnp.float32)

        # Bias + ReLU kept in f32 (VPU path is f32-safe on v5e too).
        h = jnp.maximum(acc + b1_ref[...], 0.0)

        # FC2: lane-dense (128-padded) output; bf16 operands, f32 accumulate,
        # bf16 store (halves the dominant output HBM traffic).
        y = jnp.dot(h.astype(w2_ref.dtype), w2_ref[...],
                    preferred_element_type=jnp.float32)
        o_ref[...] = (y + b2_ref[...]).astype(o_ref.dtype)

    return kernel


def server_forward(x_list, params, *, tile_b=4096):
    """Pallas implementation of Server.forward(x_list) (returns f32 logits)."""
    w1, b1, w2p, b2p, out_dim = params
    num_parties = len(x_list)
    B, feat_dim = x_list[0].shape
    d_in, hidden = w1.shape
    out_pad = w2p.shape[1]
    assert d_in == num_parties * feat_dim

    # Memory-bound kernel: use a large batch tile (grid-step overhead ~0.35us
    # vs ~0.03us of MXU work per step).  Multiple of 16 keeps bf16 sublane
    # packing clean.  Double-buffered footprint at tile_b=4096 is only a few
    # MiB -> fits every generation, including v7x's 64 MiB VMEM.
    tile_b = max(16, min(tile_b, _round_up(B, 16)))
    # Keep >= 2 grid steps when B is large so v7x's 2 TensorCores both get
    # work under dimension_semantics=("parallel",); no-op for small B.
    if B >= 1024:
        tile_b = min(tile_b, _round_up(-(-B // 2), 256))
    b_pad = _round_up(B, tile_b)
    grid = (b_pad // tile_b,)

    # bf16 activations halve input-side HBM traffic; pad batch to the tile.
    xs = [jnp.pad(x.astype(jnp.bfloat16), ((0, b_pad - B), (0, 0)))
          for x in x_list]

    kernel = _make_server_kernel(num_parties)

    x_specs = [pl.BlockSpec((tile_b, feat_dim), lambda i: (i, 0))
               for _ in range(num_parties)]
    w_specs = [
        pl.BlockSpec((d_in, hidden), lambda i: (0, 0)),     # w1 (grid-invariant)
        pl.BlockSpec((1, hidden), lambda i: (0, 0)),        # b1
        pl.BlockSpec((hidden, out_pad), lambda i: (0, 0)),  # w2 (lane-padded)
        pl.BlockSpec((1, out_pad), lambda i: (0, 0)),       # b2 (lane-padded)
    ]

    flops = 2 * b_pad * (d_in * hidden + hidden * out_pad)
    bytes_accessed = (b_pad * d_in * 2            # bf16 inputs
                      + b_pad * out_pad * 2       # bf16 padded output
                      + w1.size * 2 + b1.size * 4
                      + w2p.size * 2 + b2p.size * 4)

    out = pl.pallas_call(
        kernel,
        out_shape=jax.ShapeDtypeStruct((b_pad, out_pad), jnp.bfloat16),
        grid=grid,
        in_specs=x_specs + w_specs,
        out_specs=pl.BlockSpec((tile_b, out_pad), lambda i: (i, 0)),
        compiler_params=pltpu.CompilerParams(
            dimension_semantics=("parallel",),
            vmem_limit_bytes=32 * 1024 * 1024),
        cost_estimate=pl.CostEstimate(
            flops=flops, transcendentals=0, bytes_accessed=bytes_accessed),
    )(*xs, w1, b1, w2p, b2p)

    # Padded rows (B..b_pad) and padded lanes (out_dim..128) are dropped here;
    # the slice+cast fuses into a single small XLA op over the bf16 slab.
    return out[:B, :out_dim].astype(jnp.float32)


def init_server_params(key, num_parties=2, embed_dim=32, hidden=128,
                       output_dim=10):
    """Parameter init matching the inferred SecondNet shapes.

    Matmul weights are stored in bf16 (f32 accumulation happens in-kernel);
    the second layer is zero-padded to a lane-dense 128-wide output.
    """
    d_in = num_parties * embed_dim
    out_pad = _round_up(output_dim, 128)
    k1, k2, k3, k4 = jax.random.split(key, 4)
    lim1 = 1.0 / jnp.sqrt(jnp.float32(d_in))
    lim2 = 1.0 / jnp.sqrt(jnp.float32(hidden))
    w1 = jax.random.uniform(k1, (d_in, hidden), jnp.float32, -lim1, lim1)
    b1 = jax.random.uniform(k2, (1, hidden), jnp.float32, -lim1, lim1)
    w2 = jax.random.uniform(k3, (hidden, output_dim), jnp.float32, -lim2, lim2)
    b2 = jax.random.uniform(k4, (1, output_dim), jnp.float32, -lim2, lim2)

    w1 = w1.astype(jnp.bfloat16)
    w2p = jnp.zeros((hidden, out_pad), jnp.bfloat16).at[:, :output_dim].set(
        w2.astype(jnp.bfloat16))
    b2p = jnp.zeros((1, out_pad), jnp.float32).at[:, :output_dim].set(b2)
    return w1, b1, w2p, b2p, output_dim


def _reference(x_list, params):
    """Pure-JAX reference with identical bf16/f32 mixed precision."""
    w1, b1, w2p, b2p, out_dim = params
    x = jnp.concatenate([x.astype(jnp.bfloat16) for x in x_list], axis=1)
    h = jnp.maximum(
        jnp.dot(x, w1, preferred_element_type=jnp.float32) + b1, 0.0)
    y = jnp.dot(h.astype(jnp.bfloat16), w2p,
                preferred_element_type=jnp.float32) + b2p
    return y.astype(jnp.bfloat16)[:, :out_dim].astype(jnp.float32)


if __name__ == "__main__":
    key = jax.random.PRNGKey(0)
    kp, kx = jax.random.split(key)

    num_parties = 2
    batch = 8
    embed_dim = 32     # per-party embedding size coming from each client
    hidden = 128
    output_dim = 10

    params = init_server_params(kp, num_parties, embed_dim, hidden, output_dim)

    xkeys = jax.random.split(kx, num_parties)
    x_list = [jax.random.normal(xkeys[i], (batch, embed_dim), jnp.float32)
              for i in range(num_parties)]

    out = server_forward(x_list, params)
    out = jax.block_until_ready(out)

    ref = _reference(x_list, params)
    assert out.shape == (batch, output_dim)
    assert jnp.allclose(out, ref, atol=2e-2, rtol=2e-2), "mismatch vs reference"

    print("KERNEL_OK")
</pallas_src>

<mosaic_0001>
module attributes {stable_mosaic.version = 11 : i64} {
  func.func @kernel(%arg0: i32, %arg1: memref<16x32xbf16, #tpu.memory_space<vmem>>, %arg2: memref<16x32xbf16, #tpu.memory_space<vmem>>, %arg3: memref<64x128xbf16, #tpu.memory_space<vmem>>, %arg4: memref<1x128xf32, #tpu.memory_space<vmem>>, %arg5: memref<128x128xbf16, #tpu.memory_space<vmem>>, %arg6: memref<1x128xf32, #tpu.memory_space<vmem>>, %arg7: memref<16x128xbf16, #tpu.memory_space<vmem>>) attributes {dimension_semantics = [#tpu.dimension_semantics<parallel>], iteration_bounds = array<i64: 1>, scalar_prefetch = 0 : i64, scratch_operands = 0 : i64, tpu.core_type = #tpu.core_type<tc>, window_params = [{transform_indices = @transform_0, window_bounds = array<i64: 16, 32>}, {transform_indices = @transform_1, window_bounds = array<i64: 16, 32>}, {pipeline_mode = #tpu.pipeline_mode<synchronous>, transform_indices = @transform_2, window_bounds = array<i64: 64, 128>}, {pipeline_mode = #tpu.pipeline_mode<synchronous>, transform_indices = @transform_3, window_bounds = array<i64: 1, 128>}, {pipeline_mode = #tpu.pipeline_mode<synchronous>, transform_indices = @transform_4, window_bounds = array<i64: 128, 128>}, {pipeline_mode = #tpu.pipeline_mode<synchronous>, transform_indices = @transform_5, window_bounds = array<i64: 1, 128>}, {transform_indices = @transform_6, window_bounds = array<i64: 16, 128>}]} {
    %c0 = arith.constant 0 : index
    %c0_0 = arith.constant 0 : index
    %0 = vector.load %arg1[%c0, %c0_0] : memref<16x32xbf16, #tpu.memory_space<vmem>>, vector<16x32xbf16>
    %c0_1 = arith.constant 0 : index
    %c0_2 = arith.constant 0 : index
    %1 = vector.load %arg2[%c0_1, %c0_2] : memref<16x32xbf16, #tpu.memory_space<vmem>>, vector<16x32xbf16>
    %2 = tpu.concatenate %0, %1 in 1 : vector<16x32xbf16>, vector<16x32xbf16> -> vector<16x64xbf16>
    %c0_3 = arith.constant 0 : index
    %c0_4 = arith.constant 0 : index
    %3 = vector.load %arg3[%c0_3, %c0_4] : memref<64x128xbf16, #tpu.memory_space<vmem>>, vector<64x128xbf16>
    %cst = arith.constant dense<0.000000e+00> : vector<16x128xf32>
    %4 = tpu.matmul %2, %3, %cst {dimension_numbers = #tpu.dot_dimension_numbers<[1], [0], [0], [1], [0, 0, 1, 1], [], []>} : vector<16x64xbf16>, vector<64x128xbf16>, vector<16x128xf32> -> vector<16x128xf32>
    %c0_5 = arith.constant 0 : index
    %c0_6 = arith.constant 0 : index
    %5 = vector.load %arg4[%c0_5, %c0_6] : memref<1x128xf32, #tpu.memory_space<vmem>>, vector<1x128xf32>
    %6 = vector.broadcast %5 : vector<1x128xf32> to vector<16x128xf32>
    %7 = arith.addf %4, %6 : vector<16x128xf32>
    %cst_7 = arith.constant 0.000000e+00 : f32
    %8 = vector.broadcast %cst_7 : f32 to vector<16x128xf32>
    %9 = arith.maximumf %7, %8 : vector<16x128xf32>
    %10 = arith.truncf %9 : vector<16x128xf32> to vector<16x128xbf16>
    %c0_8 = arith.constant 0 : index
    %c0_9 = arith.constant 0 : index
    %11 = vector.load %arg5[%c0_8, %c0_9] : memref<128x128xbf16, #tpu.memory_space<vmem>>, vector<128x128xbf16>
    %cst_10 = arith.constant dense<0.000000e+00> : vector<16x128xf32>
    %12 = tpu.matmul %10, %11, %cst_10 {dimension_numbers = #tpu.dot_dimension_numbers<[1], [0], [0], [1], [0, 0, 1, 1], [], []>} : vector<16x128xbf16>, vector<128x128xbf16>, vector<16x128xf32> -> vector<16x128xf32>
    %c0_11 = arith.constant 0 : index
    %c0_12 = arith.constant 0 : index
    %13 = vector.load %arg6[%c0_11, %c0_12] : memref<1x128xf32, #tpu.memory_space<vmem>>, vector<1x128xf32>
    %14 = vector.broadcast %13 : vector<1x128xf32> to vector<16x128xf32>
    %15 = arith.addf %12, %14 : vector<16x128xf32>
    %16 = arith.truncf %15 : vector<16x128xf32> to vector<16x128xbf16>
    %c0_13 = arith.constant 0 : index
    %c0_14 = arith.constant 0 : index
    %17 = vector.load %arg7[%c0_13, %c0_14] : memref<16x128xbf16, #tpu.memory_space<vmem>>, vector<16x128xbf16>
    tpu.vector_store %arg7[%c0_13, %c0_14], %16 {strides = array<i32>} : memref<16x128xbf16, #tpu.memory_space<vmem>>, vector<16x128xbf16>,
    return
  }
  func.func @transform_0(%arg0: i32) -> (i32, i32) {
    %c0_i32 = arith.constant 0 : i32
    %c0_i32_0 = arith.constant 0 : i32
    return %arg0, %c0_i32 : i32, i32
  }
  func.func @transform_1(%arg0: i32) -> (i32, i32) {
    %c0_i32 = arith.constant 0 : i32
    %c0_i32_0 = arith.constant 0 : i32
    return %arg0, %c0_i32 : i32, i32
  }
  func.func @transform_2(%arg0: i32) -> (i32, i32) {
    %c0_i32 = arith.constant 0 : i32
    %c0_i32_0 = arith.constant 0 : i32
    %c0_i32_1 = arith.constant 0 : i32
    return %c0_i32, %c0_i32_0 : i32, i32
  }
  func.func @transform_3(%arg0: i32) -> (i32, i32) {
    %c0_i32 = arith.constant 0 : i32
    %c0_i32_0 = arith.constant 0 : i32
    %c0_i32_1 = arith.constant 0 : i32
    return %c0_i32, %c0_i32_0 : i32, i32
  }
  func.func @transform_4(%arg0: i32) -> (i32, i32) {
    %c0_i32 = arith.constant 0 : i32
    %c0_i32_0 = arith.constant 0 : i32
    %c0_i32_1 = arith.constant 0 : i32
    return %c0_i32, %c0_i32_0 : i32, i32
  }
  func.func @transform_5(%arg0: i32) -> (i32, i32) {
    %c0_i32 = arith.constant 0 : i32
    %c0_i32_0 = arith.constant 0 : i32
    %c0_i32_1 = arith.constant 0 : i32
    return %c0_i32, %c0_i32_0 : i32, i32
  }
  func.func @transform_6(%arg0: i32) -> (i32, i32) {
    %c0_i32 = arith.constant 0 : i32
    %c0_i32_0 = arith.constant 0 : i32
    return %arg0, %c0_i32 : i32, i32
  }
}

</mosaic_0001>

<bundles_post_ra>
// kernel: tpu_custom_call.1
= control target key start
LH: loop header
LB: loop body
LE: loop exit
PB: predicated region body
PF: predicated region fallthrough
CT: control target
= control target key end

     0   :  { %11 = vsyncpa [#allocation3], 0  ;;  %s681_s0 = inlined_call_operand.hbm [shape: bf16[16,32], index: 0, kind: input, shape index: {}]   ;;  %s682_s1 = inlined_call_operand.hbm [shape: bf16[16,32], index: 1, kind: input, shape index: {}]   ;;  %s683_s2 = inlined_call_operand.hbm [shape: bf16[64,128], index: 2, kind: input, shape index: {}]   ;;  %s684_s3 = inlined_call_operand.vmem [shape: f32[1,128], index: 3, kind: input, shape index: {}]   ;;  %s685_s4 = inlined_call_operand.hbm [shape: bf16[128,128], index: 4, kind: input, shape index: {}]   ;;  %s686_s5 = inlined_call_operand.vmem [shape: f32[1,128], index: 5, kind: input, shape index: {}]   ;;  %s687_s6 = inlined_call_operand.hbm [shape: bf16[16,128], index: 6, kind: output, shape index: {}]  }
   0x1   :  { %12 = vsyncpa [#allocation6], 0 }
   0x2   :  { %13 = vsyncpa [#allocation9], 0 }
   0x3   :  { %14 = vsyncpa [#allocation4], 0  ;;  %s541_s21 = smov [#allocation5]   ;;  %s542_s23 = smov [#allocation2]  }
   0x4   :  { %s32_s22 = sshll.u32 %s541_s21, 4  ;;  %s20_s24 = sshll.u32 %s542_s23, 4  ;;  %s33_s22 = int_to_ptr.vmem [resolvable:$true] %s32_s22  ;;  %s586_s24 = int_to_ptr.vmem [resolvable:$true] %s20_s24 }
   0x5   :  { %s423_s27 = scalar_lea.hbm %s682_s1, 128 }
   0x6   :  { %p424_p0 = scmp.ne.s32.totalorder %s682_s1, %s423_s27  ;;  %p427_p1 = scmp.lt.u32.totalorder %s423_s27, %s682_s1 }
   0x8   :  { %p429_p2 = pnand %p427_p1, %p424_p0 }
   0xa   :  { %432 = shalt.err (!%p429_p2)
}
   0xb   :  { %s433_s8 = scalar_lea.vmem %s33_s22, 128  ;;  %p438_p4 = scmp.lt.s32.totalorder %s33_s22, %s33_s22 }
   0xc   :  { %p434_p3 = scmp.ne.s32.totalorder %s33_s22, %s433_s8  ;;  %p439_p5 = scmp.lt.s32.totalorder %s433_s8, %s433_s8 }
   0xe   :  { %p440_p6 = por %p439_p5, %p438_p4 }
  0x10   :  { %p441_p7 = pnand %p440_p6, %p434_p3 }
  0x12   :  { %444 = shalt.err (!%p441_p7)
}
  0x13   :  { %s543_s9 = smov 64   ;;  %s544_s10 = smov 4  }
  0x14   :  { %38 = dma.hbm_to_vmem [thread:$0]  %s682_s1, 128, %s33_s22, [#allocation6], %s543_s9, %s543_s9, %s544_s10  }
  0x15   :  { %s445_s15 = scalar_lea.hbm %s681_s0, 128 }
  0x16   :  { %p446_p8 = scmp.ne.s32.totalorder %s681_s0, %s445_s15  ;;  %p449_p9 = scmp.lt.u32.totalorder %s445_s15, %s681_s0 }
  0x18   :  { %p451_p10 = pnand %p449_p9, %p446_p8 }
  0x1a   :  { %454 = shalt.err (!%p451_p10)
}
  0x1b   :  { %s455_s20 = scalar_lea.vmem %s586_s24, 128  ;;  %p460_p12 = scmp.lt.s32.totalorder %s586_s24, %s586_s24 }
  0x1c   :  { %p456_p11 = scmp.ne.s32.totalorder %s586_s24, %s455_s20  ;;  %p461_p13 = scmp.lt.s32.totalorder %s455_s20, %s455_s20 }
  0x1e   :  { %p462_p0 = por %p461_p13, %p460_p12 }
  0x20   :  { %p463_p1 = pnand %p462_p0, %p456_p11 }
  0x22   :  { %466 = shalt.err (!%p463_p1)
}
  0x23   :  { %26 = dma.hbm_to_vmem [thread:$0]  %s681_s0, 128, %s586_s24, [#allocation3], %s543_s9, %s543_s9, %s544_s10  }
  0x24   :  { %s545_s22 = smov [#allocation7]   ;;  %s546_s25 = smov [#allocation8]  }
  0x25   :  { %s44_s23 = sshll.u32 %s545_s22, 4  ;;  %s58_s26 = sshll.u32 %s546_s25, 4  ;;  %s45_s23 = int_to_ptr.vmem [resolvable:$true] %s44_s23  ;;  %s623_s26 = int_to_ptr.vmem [resolvable:$true] %s58_s26 }
  0x26   :  { %s467_s29 = scalar_lea.hbm %s683_s2, 512 }
  0x27   :  { %p468_p2 = scmp.ne.s32.totalorder %s683_s2, %s467_s29  ;;  %p471_p3 = scmp.lt.u32.totalorder %s467_s29, %s683_s2 }
  0x29   :  { %p473_p4 = pnand %p471_p3, %p468_p2 }
  0x2b   :  { %476 = shalt.err (!%p473_p4)
}
  0x2c   :  { %s477_s0 = scalar_lea.vmem %s45_s23, 512  ;;  %p482_p6 = scmp.lt.s32.totalorder %s45_s23, %s45_s23 }
  0x2d   :  { %p478_p5 = scmp.ne.s32.totalorder %s45_s23, %s477_s0  ;;  %p483_p7 = scmp.lt.s32.totalorder %s477_s0, %s477_s0 }
  0x2f   :  { %p484_p8 = por %p483_p7, %p482_p6 }
  0x31   :  { %p485_p9 = pnand %p484_p8, %p478_p5 }
  0x33   :  { %488 = shalt.err (!%p485_p9)
}
  0x34   :  { %50 = dma.hbm_to_vmem [thread:$0]  %s683_s2, 512, %s45_s23, [#allocation6], %s543_s9, %s543_s9, %s544_s10  }
  0x35   :  { %s489_s15 = scalar_lea.hbm %s685_s4, 1024 }
  0x36   :  { %p490_p10 = scmp.ne.s32.totalorder %s685_s4, %s489_s15  ;;  %p493_p11 = scmp.lt.u32.totalorder %s489_s15, %s685_s4 }
  0x38   :  { %p495_p12 = pnand %p493_p11, %p490_p10 }
  0x3a   :  { %498 = shalt.err (!%p495_p12)
}
  0x3b   :  { %s499_s20 = scalar_lea.vmem %s623_s26, 1024  ;;  %p504_p0 = scmp.lt.s32.totalorder %s623_s26, %s623_s26 }
  0x3c   :  { %p500_p13 = scmp.ne.s32.totalorder %s623_s26, %s499_s20  ;;  %p505_p1 = scmp.lt.s32.totalorder %s499_s20, %s499_s20 }
  0x3e   :  { %p506_p2 = por %p505_p1, %p504_p0 }
  0x40   :  { %p507_p3 = pnand %p506_p2, %p500_p13 }
  0x42   :  { %510 = shalt.err (!%p507_p3)
}
  0x43   :  { %64 = dma.hbm_to_vmem [thread:$0]  %s685_s4, 1024, %s623_s26, [#allocation9], %s543_s9, %s543_s9, %s544_s10  }
  0x44   :  { %533 = dma.done.wait [#allocation3], 128  }
  0x45   :  { %534 = vsyncadd [#allocation3], 4294967168 }
  0x46   :  { %535 = dma.done.wait [#allocation6], 640  }
  0x47   :  { %536 = vsyncadd [#allocation6], 4294966656 }
  0x48   :  { %537 = dma.done.wait [#allocation9], 1024  }
  0x49   :  { %538 = vsyncadd [#allocation9], 4294966272  ;;  %v547_v0 = vmov 0.0   ;;  %vm548_vm0 = vmmov 0   ;;  %v409_v1 = vld [vmem:[#allocation5] sm:$0xff]   ;;  %v410_v2 = vld [vmem:[#allocation7] sm:$0xff]  }
  0x4a   :  { %367 = vmatprep.subr.bf16.mxu0 %v547_v0  ;;  %375 = vmatprep.mubr.msk.bf16.mxu0 %vm548_vm0, %v547_v0  ;;  %s549_s21 = smov 32   ;;  %v411_v3 = vld [vmem:[#allocation7 + $0x8] sm:$0xff]   ;;  %v415_v4 = vld [vmem:[#allocation8] sm:$0xff]   ;;  %v412_v5 = vld [vmem:[#allocation7 + $0x10] sm:$0xff]   ;;  %vm96_vm1 = vcmask 261120   ;;  %vm139_vm2 = vcmask 523264  }
  0x4b   :  { %379 = vmatprep.subr.bf16.mxu1 %v547_v0  ;;  %395 = vmatprep.mubr.msk.bf16.mxu1 %vm548_vm0, %v547_v0  ;;  %v416_v6 = vld [vmem:[#allocation8 + $0x8] sm:$0xff]   ;;  %v413_v7 = vld [vmem:[#allocation7 + $0x18] sm:$0xff]   ;;  %v417_v8 = vld [vmem:[#allocation8 + $0x10] sm:$0xff]   ;;  %s550_s26 = smov [#allocation10]  }
  0x4c   :  { %94 = vrot.lane.b32.xlu0 %v409_v1, %s549_s21  ;;  %368 = vmatpush3.bf16.msra.mxu0 %v410_v2  ;;  %v418_v9 = vld [vmem:[#allocation8 + $0x18] sm:$0xff]   ;;  %v419_v10 = vld [vmem:[#allocation8 + $0x20] sm:$0xff]   ;;  %v420_v11 = vld [vmem:[#allocation8 + $0x28] sm:$0xff]   ;;  %s313_s27 = sshll.u32 %s550_s26, 4  ;;  %s314_s27 = int_to_ptr.vmem [resolvable:$true] %s313_s27 }
  0x4d   :  { %369 = vmatprep.subr.bf16.mxu0 %v547_v0  ;;  %380 = vmatpush3.bf16.msra.mxu1 %v415_v4  ;;  %v414_v12 = vld [vmem:[#allocation2] sm:$0xff]   ;;  %v422_v16 = vld [vmem:[#allocation8 + $0x38] sm:$0xff]   ;;  %p516_p5 = scmp.lt.s32.totalorder %s314_s27, %s314_s27 }
  0x4e   :  { %381 = vmatprep.subr.bf16.mxu1 %v547_v0  ;;  %v421_v15 = vld [vmem:[#allocation8 + $0x30] sm:$0xff]  }
  0x4f   :  { %v329_v17 = vld [vmem:[%s684_s3] ss:$0 sm:$0xff]  ;;  %s511_s3 = scalar_lea.vmem %s314_s27, 128 }
  0x50   :  { %370 = vmatpush3.bf16.msra.mxu0 %v411_v3  ;;  %v335_v27 = vld [vmem:[%s686_s5] ss:$0 sm:$0xff]  ;;  %p512_p4 = scmp.ne.s32.totalorder %s314_s27, %s511_s3  ;;  %p517_p6 = scmp.lt.s32.totalorder %s511_s3, %s511_s3 }
  0x51   :  { %371 = vmatprep.subr.bf16.mxu0 %v547_v0  ;;  %382 = vmatpush3.bf16.msra.mxu1 %v416_v6 }
  0x52   :  { %383 = vmatprep.subr.bf16.mxu1 %v547_v0  ;;  %p518_p7 = por %p517_p6, %p516_p5 }
  0x54   :  { %372 = vmatpush3.bf16.msra.mxu0 %v412_v5  ;;  %p519_p8 = pnand %p518_p7, %p512_p4 }
  0x55   :  { %373 = vmatprep.subr.bf16.mxu0 %v547_v0  ;;  %384 = vmatpush3.bf16.msra.mxu1 %v417_v8 }
  0x56   :  { %385 = vmatprep.subr.bf16.mxu1 %v547_v0 }
  0x58   :  { %374 = vmatpush3.bf16.msra.mxu0 %v413_v7 }
  0x59   :  { %386 = vmatpush3.bf16.msra.mxu1 %v418_v9 }
  0x5a   :  { %387 = vmatprep.subr.bf16.mxu1 %v547_v0 }
  0x5d   :  { %388 = vmatpush3.bf16.msra.mxu1 %v419_v10 }
  0x5e   :  { %389 = vmatprep.subr.bf16.mxu1 %v547_v0 }
  0x61   :  { %390 = vmatpush3.bf16.msra.mxu1 %v420_v11 }
  0x62   :  { %391 = vmatprep.subr.bf16.mxu1 %v547_v0 }
  0x65   :  { %392 = vmatpush3.bf16.msra.mxu1 %v421_v15 }
  0x66   :  { %393 = vmatprep.subr.bf16.mxu1 %v547_v0 }
  0x69   :  { %394 = vmatpush3.bf16.msra.mxu1 %v422_v16 }
  0xbe   :  { %v95_v13 = vpop.permute.xlu0 %94 }
  0xbf   :  { %v99_v14 = vsel %vm96_vm1, %v414_v12, %v95_v13 }
  0xc0   :  { %376 = vmatmul.mubr.msk.bf16.vlgmr.msra.gmra.mrb[0].mxu0 %vm139_vm2, %v99_v14 }
 0x193   :  { %v176_v18 = vpop.f32.mrb[0].mxu0 }
 0x194   :  { %v177_v19 = vadd.f32 %v329_v17, %v176_v18  ;;  %v377_v20 = vpop.f32.mrb[1].mxu0 }
 0x195   :  { %v179_v21 = vpop.f32.mrb[2].mxu0 }
 0x196   :  { %v180_v22 = vadd.f32 %v329_v17, %v179_v21  ;;  %v378_v23 = vpop.f32.mrb[3].mxu0  ;;  %v183_v24 = vmax.f32 %v177_v19, 0.0 }
 0x198   :  { %v184_v25 = vmax.f32 %v180_v22, 0.0 }
 0x19a   :  { %v185_v26 = vpack.c.bf16 %v184_v25, %v183_v24 }
 0x19c   :  { %396 = vmatmul.mubr.bf16.vlgmr.msra.gmra.mrb[0].mxu1 %v185_v26 }
 0x26f   :  { %v291_v28 = vpop.f32.mrb[0].mxu1 }
 0x270   :  { %v397_v29 = vpop.f32.mrb[1].mxu1  ;;  %v292_v31 = vadd.f32 %v335_v27, %v291_v28 }
 0x271   :  { %v294_v30 = vpop.f32.mrb[2].mxu1 }
 0x272   :  { %v295_v32 = vadd.f32 %v335_v27, %v294_v30  ;;  %v398_v33 = vpop.f32.mrb[3].mxu1 }
 0x274   :  { %v351_v34 = vpack.c.bf16 %v295_v32, %v292_v31 }
 0x276   :  { %352 = vst [vmem:[#allocation10] sm:$0xff] %v351_v34  }
 0x277   :  { %522 = shalt.err (!%p519_p8)
}
 0x278   :  { %s523_s29 = scalar_lea.hbm %s687_s6, 128 }
 0x279   :  { %p524_p9 = scmp.ne.s32.totalorder %s687_s6, %s523_s29  ;;  %p527_p10 = scmp.lt.u32.totalorder %s523_s29, %s687_s6 }
 0x27b   :  { %p529_p11 = pnand %p527_p10, %p524_p9 }
 0x27d   :  { %532 = shalt.err (!%p529_p11)
}
 0x27e   :  { %319 = dma.vmem_to_hbm [thread:$0]  %s314_s27, 128, %s687_s6, [#allocation4], %s543_s9, %s543_s9, %s544_s10  }
 0x27f   :  { %539 = dma.done.wait [#allocation4], 128  }
 0x280   :  { %540 = vsyncadd [#allocation4], 4294967168 }
 0x281   :  { %323 = vsyncpa [#allocation3], 1 }
 0x282   :  { %324 = vsyncpa [#allocation6], 1 }
 0x283   :  { %325 = vsyncpa [#allocation9], 1 }
 0x284   :  { %326 = vsyncpa [#allocation4], 1 }

</bundles_post_ra>
